<compile_context>
chip_gen: v7x
topology: tpu7x:2x2x1
jax: 0.10.0
libtpu: 0.0.40
codegen_flags: <defaults>
</compile_context>

<pallas_src>
import functools
import math

import jax
import jax.numpy as jnp
from jax.experimental import pallas as pl
from jax.experimental.pallas import tpu as pltpu


def _round_up(x, m):
    return ((x + m - 1) // m) * m


def _pad2d(a, rows, cols):
    r, c = a.shape
    if r == rows and c == cols:
        return a                      # no-op for already-aligned shapes
    return jnp.zeros((rows, cols), a.dtype).at[:r, :c].set(a)


def _sublane(dtype):
    """Minimum sublane tile for a dtype (packed sublane layouts)."""
    bits = jnp.dtype(dtype).itemsize * 8
    if bits >= 32:
        return 8
    if bits == 16:
        return 16
    return 32


@functools.lru_cache(maxsize=1)
def _tpu_config():
    """Returns (num_tensorcores, vmem_limit_bytes, fused_budget_bytes, phys_vmem)."""
    try:
        kind = jax.devices()[0].device_kind.lower()
    except Exception:
        kind = ""
    num_tc, phys = 1, 128 << 20            # v5e / v6e: 1 TC, 128 MiB VMEM
    if "7" in kind:                         # v7x: 2 TCs, 64 MiB VMEM per TC
        num_tc, phys = 2, 64 << 20
    elif "v4" in kind or "v5p" in kind:     # other megacore parts, 128 MiB
        num_tc, phys = 2, 128 << 20
    vmem_limit = int(phys * 0.75)           # ~96 MiB (v5e/v6e) / ~48 MiB (v7x)
    budget = int(vmem_limit * 0.8)          # ~20% headroom for compiler scratch
    return num_tc, vmem_limit, budget, phys


# --------------------------- fused whole-MLP kernel ---------------------------

def _fused_mlp_kernel(*refs, num_layers):
    # refs = (x, w0, b0, w1, b1, ..., w_{L-1}, b_{L-1}, out)
    x_ref = refs[0]
    o_ref = refs[1 + 2 * num_layers]
    act = x_ref[...]                           # keep MXU operands in input dtype
    for i in range(num_layers):
        w_ref = refs[1 + 2 * i]
        b_ref = refs[2 + 2 * i]
        acc = jnp.dot(act, w_ref[...], preferred_element_type=jnp.float32)
        acc = acc + b_ref[...].astype(jnp.float32)   # (1, N) broadcasts over rows
        if i != num_layers - 1:
            acc = jnp.maximum(acc, 0.0)              # ReLU on the f32 accumulator
            # Cast inter-layer activation back to the next weight's dtype so
            # bf16 models keep full-rate MXU operands (no-op for f32).
            act = acc.astype(refs[1 + 2 * (i + 1)].dtype)
        else:
            act = acc
    o_ref[...] = act.astype(o_ref.dtype)


def _mlp_fused(x, params, *, tm, vmem_limit_bytes, single_buffer_weights=True):
    M, K0 = x.shape
    L = len(params)
    dims = [K0] + [w.shape[1] for (w, _) in params]
    dims_p = [_round_up(d, 128) for d in dims]       # lane-dense feature dims
    M_pad = _round_up(M, tm)

    # Constant index_map -> resident across the grid; a second pipeline buffer
    # would be pure waste, so request a single buffer.
    resident_kw = (
        dict(pipeline_mode=pl.Buffered(1)) if single_buffer_weights else {}
    )

    x_p = _pad2d(x, M_pad, dims_p[0])
    flat_inputs = [x_p]
    in_specs = [pl.BlockSpec((tm, dims_p[0]), lambda i: (i, 0))]
    for li, (w, b) in enumerate(params):
        kp, np_ = dims_p[li], dims_p[li + 1]
        flat_inputs.append(_pad2d(w, kp, np_))
        flat_inputs.append(_pad2d(b.reshape(1, -1), 1, np_))
        in_specs.append(pl.BlockSpec((kp, np_), lambda i: (0, 0), **resident_kw))
        in_specs.append(pl.BlockSpec((1, np_), lambda i: (0, 0), **resident_kw))

    out_p = pl.pallas_call(
        functools.partial(_fused_mlp_kernel, num_layers=L),
        out_shape=jax.ShapeDtypeStruct((M_pad, dims_p[-1]), x.dtype),
        grid_spec=pltpu.PrefetchScalarGridSpec(
            num_scalar_prefetch=0,
            grid=(M_pad // tm,),
            in_specs=in_specs,
            out_specs=pl.BlockSpec((tm, dims_p[-1]), lambda i: (i, 0)),
        ),
        compiler_params=pltpu.CompilerParams(
            dimension_semantics=("parallel",),       # split M across TCs
            vmem_limit_bytes=vmem_limit_bytes,
        ),
    )(*flat_inputs)
    return out_p[:M, :dims[-1]]


# ------------------- tiled per-layer linear (fallback path) -------------------

def _tiled_linear_kernel(x_ref, w_ref, b_ref, o_ref, acc_ref, *, apply_relu):
    @pl.when(pl.program_id(2) == 0)
    def _():
        acc_ref[...] = jnp.zeros_like(acc_ref)

    acc_ref[...] += jnp.dot(x_ref[...], w_ref[...],
                            preferred_element_type=jnp.float32)

    @pl.when(pl.program_id(2) == pl.num_programs(2) - 1)
    def _():
        out = acc_ref[...] + b_ref[...].astype(jnp.float32)
        if apply_relu:
            out = jnp.maximum(out, 0.0)
        o_ref[...] = out.astype(o_ref.dtype)


def _tiled_linear(x, w, b, *, apply_relu, tm=None, tn=None, tk=None):
    _, vmem_limit, _, phys = _tpu_config()
    # Generation-aware defaults: big tiles amortize the ~0.35 us/step overhead
    # and keep MXU passes full, sized for the raised vmem_limit.
    if phys <= (64 << 20):            # v7x-class: 64 MiB per TensorCore
        dtm, dtn, dtk = 256, 1024, 512
    else:                             # v5e / v6e: 128 MiB
        dtm, dtn, dtk = 512, 1024, 1024
    tm, tn, tk = tm or dtm, tn or dtn, tk or dtk

    M, K = x.shape
    K2, N = w.shape
    assert K == K2
    tm = min(tm, _round_up(M, _sublane(x.dtype)))
    tn = min(tn, _round_up(N, 128))
    tk = min(tk, _round_up(K, 128))
    M_pad, N_pad, K_pad = _round_up(M, tm), _round_up(N, tn), _round_up(K, tk)

    x_p = _pad2d(x, M_pad, K_pad)
    w_p = _pad2d(w, K_pad, N_pad)
    b_p = _pad2d(b.reshape(1, -1), 1, N_pad)

    out_p = pl.pallas_call(
        functools.partial(_tiled_linear_kernel, apply_relu=apply_relu),
        out_shape=jax.ShapeDtypeStruct((M_pad, N_pad), x.dtype),
        grid_spec=pltpu.PrefetchScalarGridSpec(
            num_scalar_prefetch=0,
            grid=(M_pad // tm, N_pad // tn, K_pad // tk),
            in_specs=[
                pl.BlockSpec((tm, tk), lambda i, j, k: (i, k)),
                pl.BlockSpec((tk, tn), lambda i, j, k: (k, j)),
                pl.BlockSpec((1, tn), lambda i, j, k: (0, j)),
            ],
            out_specs=pl.BlockSpec((tm, tn), lambda i, j, k: (i, j)),
            scratch_shapes=[pltpu.VMEM((tm, tn), jnp.float32)],
        ),
        compiler_params=pltpu.CompilerParams(
            dimension_semantics=("parallel", "parallel", "arbitrary"),
            vmem_limit_bytes=vmem_limit,
        ),
    )(x_p, w_p, b_p)
    return out_p[:M, :N]


# --------------------------------- forward ------------------------------------

def mlp_forward(x, params, *, tm=256):
    num_tc, vmem_limit, budget, _ = _tpu_config()
    M = x.shape[0]
    sub = _sublane(x.dtype)
    tm_eff = min(tm, _round_up(M, sub))
    # Megacore: make sure the "parallel" M axis has >= num_tc steps when the
    # batch is large enough to split, so no TensorCore sits idle.
    if num_tc > 1 and (_round_up(M, tm_eff) // tm_eff) < num_tc and M > sub:
        tm_eff = max(sub, _round_up(-(-M // num_tc), sub))

    L = len(params)
    dims = [x.shape[1]] + [w.shape[1] for (w, _) in params]
    dims_p = [_round_up(d, 128) for d in dims]
    x_bytes = x.dtype.itemsize
    w_bytes = params[0][0].dtype.itemsize
    # VMEM estimate: double-buffered x/out tiles + single-buffered resident
    # weights/biases + f32 inter-layer accumulator working set.
    est = 2 * tm_eff * (dims_p[0] + dims_p[-1]) * x_bytes
    est += sum(dims_p[i] * dims_p[i + 1] + dims_p[i + 1] for i in range(L)) * w_bytes
    est += 2 * tm_eff * max(dims_p) * 4

    if est <= budget:
        try:
            return _mlp_fused(x, params, tm=tm_eff,
                              vmem_limit_bytes=vmem_limit,
                              single_buffer_weights=True)
        except Exception:
            # Defensive: fall back to double-buffered resident weights if this
            # JAX/Mosaic build rejects Buffered(1) on a constant-index spec.
            return _mlp_fused(x, params, tm=tm_eff,
                              vmem_limit_bytes=vmem_limit,
                              single_buffer_weights=False)

    # TODO(synk): when only a single layer's weights exceed the budget, keep the
    # fused call and K/N-stream just that layer (pltpu.emit_pipeline) instead of
    # round-tripping every activation through HBM.
    out = x
    for i, (w, b) in enumerate(params):
        out = _tiled_linear(out, w, b, apply_relu=(i != L - 1))
    return out


class PallasMLP:
    """Pads parameters once at construction (feature dims -> multiples of 128)
    so the per-call padding copies in the wrapper become no-ops."""

    def __init__(self, in_dim, params, tm=256):
        self.out_dim = params[-1][0].shape[1]
        self.tm = tm
        dims = [in_dim] + [w.shape[1] for (w, _) in params]
        dims_p = [_round_up(d, 128) for d in dims]
        self.in_dim_p = dims_p[0]
        self.params = [
            (_pad2d(w, dims_p[i], dims_p[i + 1]),
             _pad2d(b.reshape(1, -1), 1, dims_p[i + 1]).reshape(-1))
            for i, (w, b) in enumerate(params)
        ]

    def __call__(self, x):
        x = _pad2d(x, x.shape[0], self.in_dim_p)
        out = mlp_forward(x, self.params, tm=self.tm)
        return out[:, :self.out_dim]


def init_mlp_params(key, L, in_dim, h_dim, out_dim, dtype=jnp.float32):
    """Deterministic init mirroring torch.nn.Linear's uniform(-1/sqrt(fan_in), ...)."""
    dims = []
    for i in range(L):
        if i == 0:
            dims.append((in_dim, h_dim))
        elif i == L - 1:
            dims.append((h_dim, out_dim))
        else:
            dims.append((h_dim, h_dim))
    params = []
    for (fan_in, fan_out) in dims:
        key, kw, kb = jax.random.split(key, 3)
        bound = 1.0 / math.sqrt(fan_in)
        w = jax.random.uniform(kw, (fan_in, fan_out), dtype, -bound, bound)
        b = jax.random.uniform(kb, (fan_out,), dtype, -bound, bound)
        params.append((w, b))
    return params


if __name__ == "__main__":
    L, in_dim, h_dim, out_dim = 3, 32, 64, 16
    batch = 8

    key = jax.random.PRNGKey(0)
    key, kx = jax.random.split(key)
    x = jax.random.normal(kx, (batch, in_dim), jnp.float32)
    params = init_mlp_params(key, L, in_dim, h_dim, out_dim)

    # Plain-JAX reference.
    ref = x
    for i, (w, b) in enumerate(params):
        ref = ref @ w + b
        if i != L - 1:
            ref = jnp.maximum(ref, 0.0)

    # Fused single-kernel MLP forward (functional API).
    out = mlp_forward(x, params)
    jax.block_until_ready(out)
    assert out.shape == (batch, out_dim)
    assert jnp.allclose(out, ref, atol=1e-4, rtol=1e-4), float(
        jnp.max(jnp.abs(out - ref)))

    # Pre-padded-params wrapper (padding done once at construction).
    mlp = PallasMLP(in_dim, params)
    out2 = mlp(x)
    jax.block_until_ready(out2)
    assert out2.shape == (batch, out_dim)
    assert jnp.allclose(out2, ref, atol=1e-4, rtol=1e-4)

    # Also exercise the tiled fallback linear on one layer.
    w0, b0 = params[0]
    lin = _tiled_linear(x, w0, b0, apply_relu=True)
    jax.block_until_ready(lin)
    lin_ref = jnp.maximum(x @ w0 + b0, 0.0)
    assert jnp.allclose(lin, lin_ref, atol=1e-4, rtol=1e-4)

    print("KERNEL_OK")
</pallas_src>

<mosaic_0001>
module attributes {stable_mosaic.version = 11 : i64} {
  func.func @_fused_mlp_kernel(%arg0: i32, %arg1: memref<8x128xf32, #tpu.memory_space<vmem>>, %arg2: memref<128x128xf32, #tpu.memory_space<vmem>>, %arg3: memref<1x128xf32, #tpu.memory_space<vmem>>, %arg4: memref<128x128xf32, #tpu.memory_space<vmem>>, %arg5: memref<1x128xf32, #tpu.memory_space<vmem>>, %arg6: memref<128x128xf32, #tpu.memory_space<vmem>>, %arg7: memref<1x128xf32, #tpu.memory_space<vmem>>, %arg8: memref<8x128xf32, #tpu.memory_space<vmem>>) attributes {dimension_semantics = [#tpu.dimension_semantics<parallel>], iteration_bounds = array<i64: 1>, scalar_prefetch = 0 : i64, scratch_operands = 0 : i64, tpu.core_type = #tpu.core_type<tc>, window_params = [{transform_indices = @transform_0, window_bounds = array<i64: 8, 128>}, {pipeline_mode = #tpu.pipeline_mode<synchronous>, transform_indices = @transform_1, window_bounds = array<i64: 128, 128>}, {pipeline_mode = #tpu.pipeline_mode<synchronous>, transform_indices = @transform_2, window_bounds = array<i64: 1, 128>}, {pipeline_mode = #tpu.pipeline_mode<synchronous>, transform_indices = @transform_3, window_bounds = array<i64: 128, 128>}, {pipeline_mode = #tpu.pipeline_mode<synchronous>, transform_indices = @transform_4, window_bounds = array<i64: 1, 128>}, {pipeline_mode = #tpu.pipeline_mode<synchronous>, transform_indices = @transform_5, window_bounds = array<i64: 128, 128>}, {pipeline_mode = #tpu.pipeline_mode<synchronous>, transform_indices = @transform_6, window_bounds = array<i64: 1, 128>}, {transform_indices = @transform_7, window_bounds = array<i64: 8, 128>}]} {
    %c0 = arith.constant 0 : index
    %c0_0 = arith.constant 0 : index
    %0 = vector.load %arg1[%c0, %c0_0] : memref<8x128xf32, #tpu.memory_space<vmem>>, vector<8x128xf32>
    %c0_1 = arith.constant 0 : index
    %c0_2 = arith.constant 0 : index
    %1 = vector.load %arg2[%c0_1, %c0_2] : memref<128x128xf32, #tpu.memory_space<vmem>>, vector<128x128xf32>
    %cst = arith.constant dense<0.000000e+00> : vector<8x128xf32>
    %2 = tpu.matmul %0, %1, %cst {dimension_numbers = #tpu.dot_dimension_numbers<[1], [0], [0], [1], [0, 0, 1, 1], [], []>} : vector<8x128xf32>, vector<128x128xf32>, vector<8x128xf32> -> vector<8x128xf32>
    %c0_3 = arith.constant 0 : index
    %c0_4 = arith.constant 0 : index
    %3 = vector.load %arg3[%c0_3, %c0_4] : memref<1x128xf32, #tpu.memory_space<vmem>>, vector<1x128xf32>
    %4 = vector.broadcast %3 : vector<1x128xf32> to vector<8x128xf32>
    %5 = arith.addf %2, %4 : vector<8x128xf32>
    %cst_5 = arith.constant 0.000000e+00 : f32
    %6 = vector.broadcast %cst_5 : f32 to vector<8x128xf32>
    %7 = arith.maximumf %5, %6 : vector<8x128xf32>
    %c0_6 = arith.constant 0 : index
    %c0_7 = arith.constant 0 : index
    %8 = vector.load %arg4[%c0_6, %c0_7] : memref<128x128xf32, #tpu.memory_space<vmem>>, vector<128x128xf32>
    %cst_8 = arith.constant dense<0.000000e+00> : vector<8x128xf32>
    %9 = tpu.matmul %7, %8, %cst_8 {dimension_numbers = #tpu.dot_dimension_numbers<[1], [0], [0], [1], [0, 0, 1, 1], [], []>} : vector<8x128xf32>, vector<128x128xf32>, vector<8x128xf32> -> vector<8x128xf32>
    %c0_9 = arith.constant 0 : index
    %c0_10 = arith.constant 0 : index
    %10 = vector.load %arg5[%c0_9, %c0_10] : memref<1x128xf32, #tpu.memory_space<vmem>>, vector<1x128xf32>
    %11 = vector.broadcast %10 : vector<1x128xf32> to vector<8x128xf32>
    %12 = arith.addf %9, %11 : vector<8x128xf32>
    %cst_11 = arith.constant 0.000000e+00 : f32
    %13 = vector.broadcast %cst_11 : f32 to vector<8x128xf32>
    %14 = arith.maximumf %12, %13 : vector<8x128xf32>
    %c0_12 = arith.constant 0 : index
    %c0_13 = arith.constant 0 : index
    %15 = vector.load %arg6[%c0_12, %c0_13] : memref<128x128xf32, #tpu.memory_space<vmem>>, vector<128x128xf32>
    %cst_14 = arith.constant dense<0.000000e+00> : vector<8x128xf32>
    %16 = tpu.matmul %14, %15, %cst_14 {dimension_numbers = #tpu.dot_dimension_numbers<[1], [0], [0], [1], [0, 0, 1, 1], [], []>} : vector<8x128xf32>, vector<128x128xf32>, vector<8x128xf32> -> vector<8x128xf32>
    %c0_15 = arith.constant 0 : index
    %c0_16 = arith.constant 0 : index
    %17 = vector.load %arg7[%c0_15, %c0_16] : memref<1x128xf32, #tpu.memory_space<vmem>>, vector<1x128xf32>
    %18 = vector.broadcast %17 : vector<1x128xf32> to vector<8x128xf32>
    %19 = arith.addf %16, %18 : vector<8x128xf32>
    %c0_17 = arith.constant 0 : index
    %c0_18 = arith.constant 0 : index
    %20 = vector.load %arg8[%c0_17, %c0_18] : memref<8x128xf32, #tpu.memory_space<vmem>>, vector<8x128xf32>
    tpu.vector_store %arg8[%c0_17, %c0_18], %19 {strides = array<i32>} : memref<8x128xf32, #tpu.memory_space<vmem>>, vector<8x128xf32>,
    return
  }
  func.func @transform_0(%arg0: i32) -> (i32, i32) {
    %c0_i32 = arith.constant 0 : i32
    %c0_i32_0 = arith.constant 0 : i32
    return %arg0, %c0_i32 : i32, i32
  }
  func.func @transform_1(%arg0: i32) -> (i32, i32) {
    %c0_i32 = arith.constant 0 : i32
    %c0_i32_0 = arith.constant 0 : i32
    %c0_i32_1 = arith.constant 0 : i32
    return %c0_i32, %c0_i32_0 : i32, i32
  }
  func.func @transform_2(%arg0: i32) -> (i32, i32) {
    %c0_i32 = arith.constant 0 : i32
    %c0_i32_0 = arith.constant 0 : i32
    %c0_i32_1 = arith.constant 0 : i32
    return %c0_i32, %c0_i32_0 : i32, i32
  }
  func.func @transform_3(%arg0: i32) -> (i32, i32) {
    %c0_i32 = arith.constant 0 : i32
    %c0_i32_0 = arith.constant 0 : i32
    %c0_i32_1 = arith.constant 0 : i32
    return %c0_i32, %c0_i32_0 : i32, i32
  }
  func.func @transform_4(%arg0: i32) -> (i32, i32) {
    %c0_i32 = arith.constant 0 : i32
    %c0_i32_0 = arith.constant 0 : i32
    %c0_i32_1 = arith.constant 0 : i32
    return %c0_i32, %c0_i32_0 : i32, i32
  }
  func.func @transform_5(%arg0: i32) -> (i32, i32) {
    %c0_i32 = arith.constant 0 : i32
    %c0_i32_0 = arith.constant 0 : i32
    %c0_i32_1 = arith.constant 0 : i32
    return %c0_i32, %c0_i32_0 : i32, i32
  }
  func.func @transform_6(%arg0: i32) -> (i32, i32) {
    %c0_i32 = arith.constant 0 : i32
    %c0_i32_0 = arith.constant 0 : i32
    %c0_i32_1 = arith.constant 0 : i32
    return %c0_i32, %c0_i32_0 : i32, i32
  }
  func.func @transform_7(%arg0: i32) -> (i32, i32) {
    %c0_i32 = arith.constant 0 : i32
    %c0_i32_0 = arith.constant 0 : i32
    return %arg0, %c0_i32 : i32, i32
  }
}

module attributes {stable_mosaic.version = 11 : i64} {
  func.func @_fused_mlp_kernel(%arg0: i32, %arg1: memref<8x128xf32, #tpu.memory_space<vmem>>, %arg2: memref<128x128xf32, #tpu.memory_space<vmem>>, %arg3: memref<1x128xf32, #tpu.memory_space<vmem>>, %arg4: memref<128x128xf32, #tpu.memory_space<vmem>>, %arg5: memref<1x128xf32, #tpu.memory_space<vmem>>, %arg6: memref<128x128xf32, #tpu.memory_space<vmem>>, %arg7: memref<1x128xf32, #tpu.memory_space<vmem>>, %arg8: memref<8x128xf32, #tpu.memory_space<vmem>>) attributes {dimension_semantics = [#tpu.dimension_semantics<parallel>], iteration_bounds = array<i64: 1>, scalar_prefetch = 0 : i64, scratch_operands = 0 : i64, tpu.core_type = #tpu.core_type<tc>, window_params = [{transform_indices = @transform_0, window_bounds = array<i64: 8, 128>}, {pipeline_mode = #tpu.pipeline_mode<synchronous>, transform_indices = @transform_1, window_bounds = array<i64: 128, 128>}, {pipeline_mode = #tpu.pipeline_mode<synchronous>, transform_indices = @transform_2, window_bounds = array<i64: 1, 128>}, {pipeline_mode = #tpu.pipeline_mode<synchronous>, transform_indices = @transform_3, window_bounds = array<i64: 128, 128>}, {pipeline_mode = #tpu.pipeline_mode<synchronous>, transform_indices = @transform_4, window_bounds = array<i64: 1, 128>}, {pipeline_mode = #tpu.pipeline_mode<synchronous>, transform_indices = @transform_5, window_bounds = array<i64: 128, 128>}, {pipeline_mode = #tpu.pipeline_mode<synchronous>, transform_indices = @transform_6, window_bounds = array<i64: 1, 128>}, {transform_indices = @transform_7, window_bounds = array<i64: 8, 128>}]} {
    %c0 = arith.constant 0 : index
    %c0_0 = arith.constant 0 : index
    %0 = vector.load %arg1[%c0, %c0_0] : memref<8x128xf32, #tpu.memory_space<vmem>>, vector<8x128xf32>
    %c0_1 = arith.constant 0 : index
    %c0_2 = arith.constant 0 : index
    %1 = vector.load %arg2[%c0_1, %c0_2] : memref<128x128xf32, #tpu.memory_space<vmem>>, vector<128x128xf32>
    %cst = arith.constant dense<0.000000e+00> : vector<8x128xf32>
    %2 = tpu.matmul %0, %1, %cst {dimension_numbers = #tpu.dot_dimension_numbers<[1], [0], [0], [1], [0, 0, 1, 1], [], []>} : vector<8x128xf32>, vector<128x128xf32>, vector<8x128xf32> -> vector<8x128xf32>
    %c0_3 = arith.constant 0 : index
    %c0_4 = arith.constant 0 : index
    %3 = vector.load %arg3[%c0_3, %c0_4] : memref<1x128xf32, #tpu.memory_space<vmem>>, vector<1x128xf32>
    %4 = vector.broadcast %3 : vector<1x128xf32> to vector<8x128xf32>
    %5 = arith.addf %2, %4 : vector<8x128xf32>
    %cst_5 = arith.constant 0.000000e+00 : f32
    %6 = vector.broadcast %cst_5 : f32 to vector<8x128xf32>
    %7 = arith.maximumf %5, %6 : vector<8x128xf32>
    %c0_6 = arith.constant 0 : index
    %c0_7 = arith.constant 0 : index
    %8 = vector.load %arg4[%c0_6, %c0_7] : memref<128x128xf32, #tpu.memory_space<vmem>>, vector<128x128xf32>
    %cst_8 = arith.constant dense<0.000000e+00> : vector<8x128xf32>
    %9 = tpu.matmul %7, %8, %cst_8 {dimension_numbers = #tpu.dot_dimension_numbers<[1], [0], [0], [1], [0, 0, 1, 1], [], []>} : vector<8x128xf32>, vector<128x128xf32>, vector<8x128xf32> -> vector<8x128xf32>
    %c0_9 = arith.constant 0 : index
    %c0_10 = arith.constant 0 : index
    %10 = vector.load %arg5[%c0_9, %c0_10] : memref<1x128xf32, #tpu.memory_space<vmem>>, vector<1x128xf32>
    %11 = vector.broadcast %10 : vector<1x128xf32> to vector<8x128xf32>
    %12 = arith.addf %9, %11 : vector<8x128xf32>
    %cst_11 = arith.constant 0.000000e+00 : f32
    %13 = vector.broadcast %cst_11 : f32 to vector<8x128xf32>
    %14 = arith.maximumf %12, %13 : vector<8x128xf32>
    %c0_12 = arith.constant 0 : index
    %c0_13 = arith.constant 0 : index
    %15 = vector.load %arg6[%c0_12, %c0_13] : memref<128x128xf32, #tpu.memory_space<vmem>>, vector<128x128xf32>
    %cst_14 = arith.constant dense<0.000000e+00> : vector<8x128xf32>
    %16 = tpu.matmul %14, %15, %cst_14 {dimension_numbers = #tpu.dot_dimension_numbers<[1], [0], [0], [1], [0, 0, 1, 1], [], []>} : vector<8x128xf32>, vector<128x128xf32>, vector<8x128xf32> -> vector<8x128xf32>
    %c0_15 = arith.constant 0 : index
    %c0_16 = arith.constant 0 : index
    %17 = vector.load %arg7[%c0_15, %c0_16] : memref<1x128xf32, #tpu.memory_space<vmem>>, vector<1x128xf32>
    %18 = vector.broadcast %17 : vector<1x128xf32> to vector<8x128xf32>
    %19 = arith.addf %16, %18 : vector<8x128xf32>
    %c0_17 = arith.constant 0 : index
    %c0_18 = arith.constant 0 : index
    %20 = vector.load %arg8[%c0_17, %c0_18] : memref<8x128xf32, #tpu.memory_space<vmem>>, vector<8x128xf32>
    tpu.vector_store %arg8[%c0_17, %c0_18], %19 {strides = array<i32>} : memref<8x128xf32, #tpu.memory_space<vmem>>, vector<8x128xf32>,
    return
  }
  func.func @transform_0(%arg0: i32) -> (i32, i32) {
    %c0_i32 = arith.constant 0 : i32
    %c0_i32_0 = arith.constant 0 : i32
    return %arg0, %c0_i32 : i32, i32
  }
  func.func @transform_1(%arg0: i32) -> (i32, i32) {
    %c0_i32 = arith.constant 0 : i32
    %c0_i32_0 = arith.constant 0 : i32
    %c0_i32_1 = arith.constant 0 : i32
    return %c0_i32, %c0_i32_0 : i32, i32
  }
  func.func @transform_2(%arg0: i32) -> (i32, i32) {
    %c0_i32 = arith.constant 0 : i32
    %c0_i32_0 = arith.constant 0 : i32
    %c0_i32_1 = arith.constant 0 : i32
    return %c0_i32, %c0_i32_0 : i32, i32
  }
  func.func @transform_3(%arg0: i32) -> (i32, i32) {
    %c0_i32 = arith.constant 0 : i32
    %c0_i32_0 = arith.constant 0 : i32
    %c0_i32_1 = arith.constant 0 : i32
    return %c0_i32, %c0_i32_0 : i32, i32
  }
  func.func @transform_4(%arg0: i32) -> (i32, i32) {
    %c0_i32 = arith.constant 0 : i32
    %c0_i32_0 = arith.constant 0 : i32
    %c0_i32_1 = arith.constant 0 : i32
    return %c0_i32, %c0_i32_0 : i32, i32
  }
  func.func @transform_5(%arg0: i32) -> (i32, i32) {
    %c0_i32 = arith.constant 0 : i32
    %c0_i32_0 = arith.constant 0 : i32
    %c0_i32_1 = arith.constant 0 : i32
    return %c0_i32, %c0_i32_0 : i32, i32
  }
  func.func @transform_6(%arg0: i32) -> (i32, i32) {
    %c0_i32 = arith.constant 0 : i32
    %c0_i32_0 = arith.constant 0 : i32
    %c0_i32_1 = arith.constant 0 : i32
    return %c0_i32, %c0_i32_0 : i32, i32
  }
  func.func @transform_7(%arg0: i32) -> (i32, i32) {
    %c0_i32 = arith.constant 0 : i32
    %c0_i32_0 = arith.constant 0 : i32
    return %arg0, %c0_i32 : i32, i32
  }
}

</mosaic_0001>

<bundles_post_ra>
// kernel: tpu_custom_call.1
= control target key start
LH: loop header
LB: loop body
LE: loop exit
PB: predicated region body
PF: predicated region fallthrough
CT: control target
= control target key end

     0   :  { %12 = vsyncpa [#allocation3], 0  ;;  %s1033_s0 = inlined_call_operand.hbm [shape: f32[8,128], index: 0, kind: input, shape index: {}]   ;;  %s1034_s1 = inlined_call_operand.hbm [shape: f32[128,128], index: 1, kind: input, shape index: {}]   ;;  %s1035_s2 = inlined_call_operand.hbm [shape: f32[1,128], index: 2, kind: input, shape index: {}]   ;;  %s1036_s3 = inlined_call_operand.hbm [shape: f32[128,128], index: 3, kind: input, shape index: {}]   ;;  %s1037_s4 = inlined_call_operand.hbm [shape: f32[1,128], index: 4, kind: input, shape index: {}]   ;;  %s1038_s5 = inlined_call_operand.hbm [shape: f32[128,128], index: 5, kind: input, shape index: {}]   ;;  %s1039_s6 = inlined_call_operand.hbm [shape: f32[1,128], index: 6, kind: input, shape index: {}]   ;;  %s1040_s7 = inlined_call_operand.hbm [shape: f32[8,128], index: 7, kind: output, shape index: {}]  }
   0x1   :  { %13 = vsyncpa [#allocation6], 0 }
   0x2   :  { %14 = vsyncpa [#allocation9], 0 }
   0x3   :  { %15 = vsyncpa [#allocation12], 0 }
   0x4   :  { %16 = vsyncpa [#allocation4], 0  ;;  %s845_s24 = smov [#allocation5]   ;;  %s659_s28 = scalar_lea.hbm %s1034_s1, 2048 }
   0x5   :  { %s32_s25 = sshll.u32 %s845_s24, 4  ;;  %p660_p0 = scmp.ne.s32.totalorder %s1034_s1, %s659_s28  ;;  %s33_s25 = int_to_ptr.vmem [resolvable:$true] %s32_s25 }
   0x6   :  { %p663_p1 = scmp.lt.u32.totalorder %s659_s28, %s1034_s1 }
   0x8   :  { %p665_p2 = pnand %p663_p1, %p660_p0 }
   0xa   :  { %668 = shalt.err (!%p665_p2)
}
   0xb   :  { %s669_s10 = scalar_lea.vmem %s33_s25, 2048  ;;  %p674_p4 = scmp.lt.s32.totalorder %s33_s25, %s33_s25 }
   0xc   :  { %p670_p3 = scmp.ne.s32.totalorder %s33_s25, %s669_s10  ;;  %p675_p5 = scmp.lt.s32.totalorder %s669_s10, %s669_s10 }
   0xe   :  { %p676_p6 = por %p675_p5, %p674_p4 }
  0x10   :  { %p677_p7 = pnand %p676_p6, %p670_p3 }
  0x12   :  { %680 = shalt.err (!%p677_p7)
}
  0x13   :  { %s846_s11 = smov 128   ;;  %s847_s12 = smov 8  }
  0x14   :  { %38 = dma.hbm_to_vmem [thread:$0]  %s1034_s1, 2048, %s33_s25, [#allocation6], %s846_s11, %s846_s11, %s847_s12  }
  0x15   :  { %s848_s15 = smov [#allocation8]   ;;  %s849_s17 = smov [#allocation11]  }
  0x16   :  { %s54_s16 = sshll.u32 %s848_s15, 4  ;;  %s76_s18 = sshll.u32 %s849_s17, 4  ;;  %s55_s16 = int_to_ptr.vmem [resolvable:$true] %s54_s16  ;;  %s77_s18 = int_to_ptr.vmem [resolvable:$true] %s76_s18 }
  0x17   :  { %s681_s21 = scalar_lea.hbm %s1036_s3, 2048 }
  0x18   :  { %p682_p8 = scmp.ne.s32.totalorder %s1036_s3, %s681_s21  ;;  %p685_p9 = scmp.lt.u32.totalorder %s681_s21, %s1036_s3 }
  0x1a   :  { %p687_p10 = pnand %p685_p9, %p682_p8 }
  0x1c   :  { %690 = shalt.err (!%p687_p10)
}
  0x1d   :  { %s691_s1 = scalar_lea.vmem %s55_s16, 2048  ;;  %p696_p12 = scmp.lt.s32.totalorder %s55_s16, %s55_s16 }
  0x1e   :  { %p692_p11 = scmp.ne.s32.totalorder %s55_s16, %s691_s1  ;;  %p697_p13 = scmp.lt.s32.totalorder %s691_s1, %s691_s1 }
  0x20   :  { %p698_p0 = por %p697_p13, %p696_p12 }
  0x22   :  { %p699_p1 = pnand %p698_p0, %p692_p11 }
  0x24   :  { %702 = shalt.err (!%p699_p1)
}
  0x25   :  { %60 = dma.hbm_to_vmem [thread:$0]  %s1036_s3, 2048, %s55_s16, [#allocation9], %s846_s11, %s846_s11, %s847_s12  }
  0x26   :  { %s703_s30 = scalar_lea.hbm %s1038_s5, 2048 }
  0x27   :  { %p704_p2 = scmp.ne.s32.totalorder %s1038_s5, %s703_s30  ;;  %p707_p3 = scmp.lt.u32.totalorder %s703_s30, %s1038_s5 }
  0x29   :  { %p709_p4 = pnand %p707_p3, %p704_p2 }
  0x2b   :  { %712 = shalt.err (!%p709_p4)
}
  0x2c   :  { %s713_s14 = scalar_lea.vmem %s77_s18, 2048  ;;  %p718_p6 = scmp.lt.s32.totalorder %s77_s18, %s77_s18 }
  0x2d   :  { %p714_p5 = scmp.ne.s32.totalorder %s77_s18, %s713_s14  ;;  %p719_p7 = scmp.lt.s32.totalorder %s713_s14, %s713_s14 }
  0x2f   :  { %p720_p8 = por %p719_p7, %p718_p6 }
  0x31   :  { %p721_p9 = pnand %p720_p8, %p714_p5 }
  0x33   :  { %724 = shalt.err (!%p721_p9)
}
  0x34   :  { %82 = dma.hbm_to_vmem [thread:$0]  %s1038_s5, 2048, %s77_s18, [#allocation12], %s846_s11, %s846_s11, %s847_s12  }
  0x35   :  { %s850_s16 = smov [#allocation2]   ;;  %s851_s19 = smov [#allocation7]  }
  0x36   :  { %s23_s17 = sshll.u32 %s850_s16, 4  ;;  %s45_s20 = sshll.u32 %s851_s19, 4  ;;  %s24_s17 = int_to_ptr.vmem [resolvable:$true] %s23_s17  ;;  %s46_s20 = int_to_ptr.vmem [resolvable:$true] %s45_s20 }
  0x37   :  { %s725_s23 = scalar_lea.hbm %s1033_s0, 128 }
  0x38   :  { %p726_p10 = scmp.ne.s32.totalorder %s1033_s0, %s725_s23  ;;  %p729_p11 = scmp.lt.u32.totalorder %s725_s23, %s1033_s0 }
  0x3a   :  { %p731_p12 = pnand %p729_p11, %p726_p10 }
  0x3c   :  { %734 = shalt.err (!%p731_p12)
}
  0x3d   :  { %s735_s5 = scalar_lea.vmem %s24_s17, 128  ;;  %p740_p0 = scmp.lt.s32.totalorder %s24_s17, %s24_s17 }
  0x3e   :  { %p736_p13 = scmp.ne.s32.totalorder %s24_s17, %s735_s5  ;;  %p741_p1 = scmp.lt.s32.totalorder %s735_s5, %s735_s5 }
  0x40   :  { %p742_p2 = por %p741_p1, %p740_p0 }
  0x42   :  { %p743_p3 = pnand %p742_p2, %p736_p13 }
  0x44   :  { %746 = shalt.err (!%p743_p3)
}
  0x45   :  { %26 = dma.hbm_to_vmem [thread:$0]  %s1033_s0, 128, %s24_s17, [#allocation3]  }
  0x46   :  { %s747_s28 = scalar_lea.hbm %s1035_s2, 16 }
  0x47   :  { %p748_p4 = scmp.ne.s32.totalorder %s1035_s2, %s747_s28  ;;  %p751_p5 = scmp.lt.u32.totalorder %s747_s28, %s1035_s2 }
  0x49   :  { %p753_p6 = pnand %p751_p5, %p748_p4 }
  0x4b   :  { %756 = shalt.err (!%p753_p6)
}
  0x4c   :  { %s757_s10 = scalar_lea.vmem %s46_s20, 16  ;;  %s761_s13 = scalar_lea.vmem %s46_s20, 32 }
  0x4d   :  { %p758_p7 = scmp.ne.s32.totalorder %s46_s20, %s757_s10  ;;  %p762_p8 = scmp.lt.s32.totalorder %s46_s20, %s46_s20 }
  0x4e   :  { %p763_p9 = scmp.lt.s32.totalorder %s761_s13, %s757_s10 }
  0x50   :  { %p764_p10 = por %p763_p9, %p762_p8 }
  0x52   :  { %p765_p11 = pnand %p764_p10, %p758_p7 }
  0x54   :  { %768 = shalt.err (!%p765_p11)
}
  0x55   :  { %48 = dma.hbm_to_vmem [thread:$0]  %s1035_s2, 16, %s46_s20, [#allocation6]  }
  0x56   :  { %s852_s3 = smov [#allocation10]   ;;  %s853_s16 = smov [#allocation13]  }
  0x57   :  { %s67_s15 = sshll.u32 %s852_s3, 4  ;;  %s89_s17 = sshll.u32 %s853_s16, 4  ;;  %s68_s15 = int_to_ptr.vmem [resolvable:$true] %s67_s15  ;;  %s90_s17 = int_to_ptr.vmem [resolvable:$true] %s89_s17 }
  0x58   :  { %s769_s22 = scalar_lea.hbm %s1037_s4, 16 }
  0x59   :  { %p770_p12 = scmp.ne.s32.totalorder %s1037_s4, %s769_s22  ;;  %p773_p13 = scmp.lt.u32.totalorder %s769_s22, %s1037_s4 }
  0x5b   :  { %p775_p0 = pnand %p773_p13, %p770_p12 }
  0x5d   :  { %778 = shalt.err (!%p775_p0)
}
  0x5e   :  { %s779_s2 = scalar_lea.vmem %s68_s15, 16  ;;  %s783_s20 = scalar_lea.vmem %s68_s15, 32 }
  0x5f   :  { %p780_p1 = scmp.ne.s32.totalorder %s68_s15, %s779_s2  ;;  %p784_p2 = scmp.lt.s32.totalorder %s68_s15, %s68_s15 }
  0x60   :  { %p785_p3 = scmp.lt.s32.totalorder %s783_s20, %s779_s2 }
  0x62   :  { %p786_p4 = por %p785_p3, %p784_p2 }
  0x64   :  { %p787_p5 = pnand %p786_p4, %p780_p1 }
  0x66   :  { %790 = shalt.err (!%p787_p5)
}
  0x67   :  { %70 = dma.hbm_to_vmem [thread:$0]  %s1037_s4, 16, %s68_s15, [#allocation9]  }
  0x68   :  { %s791_s18 = scalar_lea.hbm %s1039_s6, 16 }
  0x69   :  { %p792_p6 = scmp.ne.s32.totalorder %s1039_s6, %s791_s18  ;;  %p795_p7 = scmp.lt.u32.totalorder %s791_s18, %s1039_s6 }
  0x6b   :  { %p797_p8 = pnand %p795_p7, %p792_p6 }
  0x6d   :  { %800 = shalt.err (!%p797_p8)
}
  0x6e   :  { %s801_s8 = scalar_lea.vmem %s90_s17, 16  ;;  %s805_s9 = scalar_lea.vmem %s90_s17, 32 }
  0x6f   :  { %p802_p9 = scmp.ne.s32.totalorder %s90_s17, %s801_s8  ;;  %p806_p10 = scmp.lt.s32.totalorder %s90_s17, %s90_s17 }
  0x70   :  { %p807_p11 = scmp.lt.s32.totalorder %s805_s9, %s801_s8 }
  0x72   :  { %p808_p12 = por %p807_p11, %p806_p10 }
  0x74   :  { %p809_p13 = pnand %p808_p12, %p802_p9 }
  0x76   :  { %812 = shalt.err (!%p809_p13)
}
  0x77   :  { %92 = dma.hbm_to_vmem [thread:$0]  %s1039_s6, 16, %s90_s17, [#allocation12]  }
  0x78   :  { %835 = dma.done.wait [#allocation3], 128  }
  0x79   :  { %836 = vsyncadd [#allocation3], 4294967168 }
  0x7a   :  { %837 = dma.done.wait [#allocation6], 2064  }
  0x7b   :  { %838 = vsyncadd [#allocation6], 4294965232 }
  0x7c   :  { %839 = dma.done.wait [#allocation9], 2064  }
  0x7d   :  { %840 = vsyncadd [#allocation9], 4294965232 }
  0x7e   :  { %841 = dma.done.wait [#allocation12], 2064  }
  0x7f   :  { %842 = vsyncadd [#allocation12], 4294965232  ;;  %v854_v0 = vmov 0.0|0.0   ;;  %vm855_vm0 = vmmov 0   ;;  %v856_v1 = vmov 0.0   ;;  %v115_v2 = vld [vmem:[#allocation5] sm:$0xff] }
  0x80   :  { %574 = vmatprep.subr.bf16.mxu0 %v854_v0  ;;  %501 = vmatprep.mubr.msk.f32.mxu0 %vm855_vm0, %v856_v1  ;;  %v116_v3 = vld [vmem:[#allocation5 + $0x8] sm:$0xff]  ;;  %v117_v4 = vld [vmem:[#allocation5 + $0x10] sm:$0xff]  ;;  %v118_v6 = vld [vmem:[#allocation5 + $0x18] sm:$0xff]  ;;  %s857_s6 = smov [#allocation14]  }
  0x81   :  { %598 = vmatprep.subr.bf16.mxu1 %v854_v0  ;;  %536 = vmatprep.mubr.msk.f32.mxu1 %vm855_vm0, %v856_v1  ;;  %v575_v5 = vpack.c.bf16 %v116_v3, %v115_v2  ;;  %v578_v7 = vpack.c.bf16 %v118_v6, %v117_v4  ;;  %v119_v8 = vld [vmem:[#allocation5 + $0x20] sm:$0xff]  ;;  %v120_v9 = vld [vmem:[#allocation5 + $0x28] sm:$0xff]  ;;  %v211_v12 = vld [vmem:[#allocation8 + $0x10] sm:$0xff]  ;;  %s403_s13 = sshll.u32 %s857_s6, 4  ;;  %s404_s13 = int_to_ptr.vmem [resolvable:$true] %s403_s13 }
  0x82   :  { %v209_v10 = vld [vmem:[#allocation8] sm:$0xff]  ;;  %v210_v11 = vld [vmem:[#allocation8 + $0x8] sm:$0xff]  ;;  %v212_v13 = vld [vmem:[#allocation8 + $0x18] sm:$0xff]  ;;  %v581_v14 = vpack.c.bf16 %v120_v9, %v119_v8  ;;  %s813_s0 = scalar_lea.vmem %s404_s13, 128  ;;  %p818_p1 = scmp.lt.s32.totalorder %s404_s13, %s404_s13 }
  0x83   :  { %576 = vmatpush3.bf16.msra.mxu0 %v575_v5  ;;  %v599_v15 = vpack.c.bf16 %v210_v11, %v209_v10  ;;  %v121_v16 = vld [vmem:[#allocation5 + $0x30] sm:$0xff]  ;;  %v122_v17 = vld [vmem:[#allocation5 + $0x38] sm:$0xff]  ;;  %v602_v18 = vpack.c.bf16 %v212_v13, %v211_v12  ;;  %v213_v19 = vld [vmem:[#allocation8 + $0x20] sm:$0xff]  ;;  %p814_p0 = scmp.ne.s32.totalorder %s404_s13, %s813_s0  ;;  %p819_p2 = scmp.lt.s32.totalorder %s813_s0, %s813_s0 }
  0x84   :  { %577 = vmatprep.subr.bf16.mxu0 %v854_v0  ;;  %v214_v20 = vld [vmem:[#allocation8 + $0x28] sm:$0xff]  ;;  %v584_v21 = vpack.c.bf16 %v122_v17, %v121_v16  ;;  %v123_v22 = vld [vmem:[#allocation5 + $0x40] sm:$0xff]  ;;  %v215_v25 = vld [vmem:[#allocation8 + $0x30] sm:$0xff] }
  0x85   :  { %600 = vmatpush3.bf16.msra.mxu1 %v599_v15  ;;  %v124_v23 = vld [vmem:[#allocation5 + $0x48] sm:$0xff]  ;;  %v605_v24 = vpack.c.bf16 %v214_v20, %v213_v19  ;;  %v216_v26 = vld [vmem:[#allocation8 + $0x38] sm:$0xff]  ;;  %v125_v28 = vld [vmem:[#allocation5 + $0x50] sm:$0xff]  ;;  %p820_p3 = por %p819_p2, %p818_p1 }
  0x86   :  { %601 = vmatprep.subr.bf16.mxu1 %v854_v0  ;;  %v587_v27 = vpack.c.bf16 %v124_v23, %v123_v22  ;;  %v126_v29 = vld [vmem:[#allocation5 + $0x58] sm:$0xff]  ;;  %v608_v30 = vpack.c.bf16 %v216_v26, %v215_v25  ;;  %v217_v31 = vld [vmem:[#allocation8 + $0x40] sm:$0xff]  ;;  %v218_v32 = vld [vmem:[#allocation8 + $0x48] sm:$0xff] }
  0x87   :  { %579 = vmatpush3.bf16.msra.mxu0 %v578_v7  ;;  %v590_v33 = vpack.c.bf16 %v126_v29, %v125_v28  ;;  %v127_v34 = vld [vmem:[#allocation5 + $0x60] sm:$0xff]  ;;  %v128_v35 = vld [vmem:[#allocation5 + $0x68] sm:$0xff]  ;;  %v611_v36 = vpack.c.bf16 %v218_v32, %v217_v31  ;;  %v219_v37 = vld [vmem:[#allocation8 + $0x50] sm:$0xff]  ;;  %p821_p4 = pnand %p820_p3, %p814_p0 }
  0x88   :  { %580 = vmatprep.subr.bf16.mxu0 %v854_v0  ;;  %v220_v38 = vld [vmem:[#allocation8 + $0x58] sm:$0xff]  ;;  %v593_v39 = vpack.c.bf16 %v128_v35, %v127_v34  ;;  %v129_v40 = vld [vmem:[#allocation5 + $0x70] sm:$0xff]  ;;  %v221_v43 = vld [vmem:[#allocation8 + $0x60] sm:$0xff] }
  0x89   :  { %603 = vmatpush3.bf16.msra.mxu1 %v602_v18  ;;  %v130_v41 = vld [vmem:[#allocation5 + $0x78] sm:$0xff]  ;;  %v614_v42 = vpack.c.bf16 %v220_v38, %v219_v37  ;;  %v222_v44 = vld [vmem:[#allocation8 + $0x68] sm:$0xff]  ;;  %v415_v9 = vld [vmem:[#allocation7] ss:$0 sm:$0xff] }
  0x8a   :  { %604 = vmatprep.subr.bf16.mxu1 %v854_v0  ;;  %v596_v45 = vpack.c.bf16 %v130_v41, %v129_v40  ;;  %v617_v46 = vpack.c.bf16 %v222_v44, %v221_v43  ;;  %v114_v47 = vld [vmem:[#allocation2] sm:$0xff]  ;;  %v303_v51 = vld [vmem:[#allocation11] sm:$0xff]  ;;  %v304_v52 = vld [vmem:[#allocation11 + $0x8] sm:$0xff] }
  0x8b   :  { %582 = vmatpush3.bf16.msra.mxu0 %v581_v14  ;;  %v223_v48 = vld [vmem:[#allocation8 + $0x70] sm:$0xff]  ;;  %v224_v49 = vld [vmem:[#allocation8 + $0x78] sm:$0xff]  ;;  %v623_v54 = vpack.c.bf16 %v304_v52, %v303_v51  ;;  %v307_v57 = vld [vmem:[#allocation11 + $0x20] sm:$0xff] }
  0x8c   :  { %583 = vmatprep.subr.bf16.mxu0 %v854_v0  ;;  %v620_v50 = vpack.c.bf16 %v224_v49, %v223_v48  ;;  %v305_v53 = vld [vmem:[#allocation11 + $0x10] sm:$0xff]  ;;  %v306_v55 = vld [vmem:[#allocation11 + $0x18] sm:$0xff]  ;;  %v308_v58 = vld [vmem:[#allocation11 + $0x28] sm:$0xff] }
  0x8d   :  { %606 = vmatpush3.bf16.msra.mxu1 %v605_v24  ;;  %v626_v56 = vpack.c.bf16 %v306_v55, %v305_v53  ;;  %v629_v59 = vpack.c.bf16 %v308_v58, %v307_v57  ;;  %v309_v60 = vld [vmem:[#allocation11 + $0x30] sm:$0xff]  ;;  %v310_v61 = vld [vmem:[#allocation11 + $0x38] sm:$0xff]  ;;  %v311_v63 = vld [vmem:[#allocation11 + $0x40] sm:$0xff] }
  0x8e   :  { %607 = vmatprep.subr.bf16.mxu1 %v854_v0  ;;  %v632_v62 = vpack.c.bf16 %v310_v61, %v309_v60  ;;  %v313_v3 = vld [vmem:[#allocation11 + $0x50] sm:$0xff]  ;;  %v314_v4 = vld [vmem:[#allocation11 + $0x58] sm:$0xff]  ;;  %v315_v6 = vld [vmem:[#allocation11 + $0x60] sm:$0xff] }
  0x8f   :  { %585 = vmatpush3.bf16.msra.mxu0 %v584_v21  ;;  %v638_v5 = vpack.c.bf16 %v314_v4, %v313_v3  ;;  %v316_v7 = vld [vmem:[#allocation11 + $0x68] sm:$0xff]  ;;  %v317_v14 = vld [vmem:[#allocation11 + $0x70] sm:$0xff]  ;;  %v318_v15 = vld [vmem:[#allocation11 + $0x78] sm:$0xff] }
  0x90   :  { %586 = vmatprep.subr.bf16.mxu0 %v854_v0  ;;  %v641_v8 = vpack.c.bf16 %v316_v7, %v315_v6  ;;  %v644_v16 = vpack.c.bf16 %v318_v15, %v317_v14  ;;  %v416_v17 = vld [vmem:[#allocation10] ss:$0 sm:$0xff]  ;;  %v417_v22 = vld [vmem:[#allocation13] ss:$0 sm:$0xff] }
  0x91   :  { %609 = vmatpush3.bf16.msra.mxu1 %v608_v30 }
  0x92   :  { %610 = vmatprep.subr.bf16.mxu1 %v854_v0 }
  0x93   :  { %588 = vmatpush3.bf16.msra.mxu0 %v587_v27 }
  0x94   :  { %589 = vmatprep.subr.bf16.mxu0 %v854_v0 }
  0x95   :  { %612 = vmatpush3.bf16.msra.mxu1 %v611_v36 }
  0x96   :  { %613 = vmatprep.subr.bf16.mxu1 %v854_v0 }
  0x97   :  { %591 = vmatpush3.bf16.msra.mxu0 %v590_v33 }
  0x98   :  { %592 = vmatprep.subr.bf16.mxu0 %v854_v0 }
  0x99   :  { %615 = vmatpush3.bf16.msra.mxu1 %v614_v42 }
  0x9a   :  { %616 = vmatprep.subr.bf16.mxu1 %v854_v0 }
  0x9b   :  { %594 = vmatpush3.bf16.msra.mxu0 %v593_v39 }
  0x9c   :  { %595 = vmatprep.subr.bf16.mxu0 %v854_v0 }
  0x9d   :  { %618 = vmatpush3.bf16.msra.mxu1 %v617_v46 }
  0x9e   :  { %619 = vmatprep.subr.bf16.mxu1 %v854_v0 }
  0x9f   :  { %597 = vmatpush3.bf16.msra.mxu0 %v596_v45 }
  0xa0   :  { %622 = vmatprep.subr.bf16.mxu0 %v854_v0 }
  0xa1   :  { %621 = vmatpush3.bf16.msra.mxu1 %v620_v50 }
  0xa2   :  { %502 = vmatmul.mubr.f32.vlgmr.msra.gmra.mrb[0].mxu0 %v114_v47 }
  0xa3   :  { %571 = vmatprep.mubr.msk.f32.mxu0 %vm855_vm0, %v856_v1  ;;  %624 = vmatpush3.bf16.msra.mxu0 %v623_v54  ;;  %v312_v1 = vld [vmem:[#allocation11 + $0x48] sm:$0xff] }
  0xa4   :  { %625 = vmatprep.subr.bf16.mxu0 %v854_v0  ;;  %v635_v2 = vpack.c.bf16 %v312_v1, %v311_v63 }
  0xa7   :  { %627 = vmatpush3.bf16.msra.mxu0 %v626_v56 }
  0xa8   :  { %628 = vmatprep.subr.bf16.mxu0 %v854_v0 }
  0xab   :  { %630 = vmatpush3.bf16.msra.mxu0 %v629_v59 }
  0xac   :  { %631 = vmatprep.subr.bf16.mxu0 %v854_v0 }
  0xaf   :  { %633 = vmatpush3.bf16.msra.mxu0 %v632_v62 }
  0xb0   :  { %634 = vmatprep.subr.bf16.mxu0 %v854_v0 }
  0xb3   :  { %636 = vmatpush3.bf16.msra.mxu0 %v635_v2 }
  0xb4   :  { %637 = vmatprep.subr.bf16.mxu0 %v854_v0 }
  0xb7   :  { %639 = vmatpush3.bf16.msra.mxu0 %v638_v5 }
  0xb8   :  { %640 = vmatprep.subr.bf16.mxu0 %v854_v0 }
  0xbb   :  { %642 = vmatpush3.bf16.msra.mxu0 %v641_v8 }
  0xbc   :  { %643 = vmatprep.subr.bf16.mxu0 %v854_v0 }
  0xbf   :  { %645 = vmatpush3.bf16.msra.mxu0 %v644_v16 }
 0x175   :  { %v204_v10 = vpop.f32.mrb[0].mxu0 }
 0x176   :  { %v205_v11 = vadd.f32 %v415_v9, %v204_v10  ;;  %v503_v12 = vpop.f32.mrb[1].mxu0 }
 0x178   :  { %v208_v13 = vmax.f32 %v205_v11, 0.0 }
 0x17a   :  { %537 = vmatmul.mubr.f32.vlgmr.msra.gmra.mrb[0].mxu1 %v208_v13 }
 0x24d   :  { %v298_v18 = vpop.f32.mrb[0].mxu1 }
 0x24e   :  { %v299_v19 = vadd.f32 %v416_v17, %v298_v18  ;;  %v538_v20 = vpop.f32.mrb[1].mxu1 }
 0x250   :  { %v302_v21 = vmax.f32 %v299_v19, 0.0 }
 0x252   :  { %572 = vmatmul.mubr.f32.vlgmr.msra.gmra.mrb[2].mxu0 %v302_v21 }
 0x325   :  { %v392_v0 = vpop.f32.mrb[2].mxu0 }
 0x326   :  { %v393_v23 = vadd.f32 %v417_v22, %v392_v0  ;;  %v573_v24 = vpop.f32.mrb[3].mxu0 }
 0x328   :  { %396 = vst [vmem:[#allocation14] sm:$0xff] %v393_v23 }
 0x329   :  { %824 = shalt.err (!%p821_p4)
}
 0x32a   :  { %s825_s15 = scalar_lea.hbm %s1040_s7, 128 }
 0x32b   :  { %p826_p5 = scmp.ne.s32.totalorder %s1040_s7, %s825_s15  ;;  %p829_p6 = scmp.lt.u32.totalorder %s825_s15, %s1040_s7 }
 0x32d   :  { %p831_p7 = pnand %p829_p6, %p826_p5 }
 0x32f   :  { %834 = shalt.err (!%p831_p7)
}
 0x330   :  { %406 = dma.vmem_to_hbm [thread:$0]  %s404_s13, 128, %s1040_s7, [#allocation4]  }
 0x331   :  { %843 = dma.done.wait [#allocation4], 128  }
 0x332   :  { %844 = vsyncadd [#allocation4], 4294967168 }
 0x333   :  { %410 = vsyncpa [#allocation3], 1 }
 0x334   :  { %411 = vsyncpa [#allocation6], 1 }
 0x335   :  { %412 = vsyncpa [#allocation9], 1 }
 0x336   :  { %413 = vsyncpa [#allocation12], 1 }
 0x337   :  { %414 = vsyncpa [#allocation4], 1 }

// kernel: tpu_custom_call.1
= control target key start
LH: loop header
LB: loop body
LE: loop exit
PB: predicated region body
PF: predicated region fallthrough
CT: control target
= control target key end

     0   :  { %12 = vsyncpa [#allocation3], 0  ;;  %s1033_s0 = inlined_call_operand.hbm [shape: f32[8,128], index: 0, kind: input, shape index: {}]   ;;  %s1034_s1 = inlined_call_operand.hbm [shape: f32[128,128], index: 1, kind: input, shape index: {}]   ;;  %s1035_s2 = inlined_call_operand.hbm [shape: f32[1,128], index: 2, kind: input, shape index: {}]   ;;  %s1036_s3 = inlined_call_operand.hbm [shape: f32[128,128], index: 3, kind: input, shape index: {}]   ;;  %s1037_s4 = inlined_call_operand.hbm [shape: f32[1,128], index: 4, kind: input, shape index: {}]   ;;  %s1038_s5 = inlined_call_operand.hbm [shape: f32[128,128], index: 5, kind: input, shape index: {}]   ;;  %s1039_s6 = inlined_call_operand.hbm [shape: f32[1,128], index: 6, kind: input, shape index: {}]   ;;  %s1040_s7 = inlined_call_operand.hbm [shape: f32[8,128], index: 7, kind: output, shape index: {}]  }
   0x1   :  { %13 = vsyncpa [#allocation6], 0 }
   0x2   :  { %14 = vsyncpa [#allocation9], 0 }
   0x3   :  { %15 = vsyncpa [#allocation12], 0 }
   0x4   :  { %16 = vsyncpa [#allocation4], 0  ;;  %s845_s24 = smov [#allocation5]   ;;  %s659_s28 = scalar_lea.hbm %s1034_s1, 2048 }
   0x5   :  { %s32_s25 = sshll.u32 %s845_s24, 4  ;;  %p660_p0 = scmp.ne.s32.totalorder %s1034_s1, %s659_s28  ;;  %s33_s25 = int_to_ptr.vmem [resolvable:$true] %s32_s25 }
   0x6   :  { %p663_p1 = scmp.lt.u32.totalorder %s659_s28, %s1034_s1 }
   0x8   :  { %p665_p2 = pnand %p663_p1, %p660_p0 }
   0xa   :  { %668 = shalt.err (!%p665_p2)
}
   0xb   :  { %s669_s10 = scalar_lea.vmem %s33_s25, 2048  ;;  %p674_p4 = scmp.lt.s32.totalorder %s33_s25, %s33_s25 }
   0xc   :  { %p670_p3 = scmp.ne.s32.totalorder %s33_s25, %s669_s10  ;;  %p675_p5 = scmp.lt.s32.totalorder %s669_s10, %s669_s10 }
   0xe   :  { %p676_p6 = por %p675_p5, %p674_p4 }
  0x10   :  { %p677_p7 = pnand %p676_p6, %p670_p3 }
  0x12   :  { %680 = shalt.err (!%p677_p7)
}
  0x13   :  { %s846_s11 = smov 128   ;;  %s847_s12 = smov 8  }
  0x14   :  { %38 = dma.hbm_to_vmem [thread:$0]  %s1034_s1, 2048, %s33_s25, [#allocation6], %s846_s11, %s846_s11, %s847_s12  }
  0x15   :  { %s848_s15 = smov [#allocation8]   ;;  %s849_s17 = smov [#allocation11]  }
  0x16   :  { %s54_s16 = sshll.u32 %s848_s15, 4  ;;  %s76_s18 = sshll.u32 %s849_s17, 4  ;;  %s55_s16 = int_to_ptr.vmem [resolvable:$true] %s54_s16  ;;  %s77_s18 = int_to_ptr.vmem [resolvable:$true] %s76_s18 }
  0x17   :  { %s681_s21 = scalar_lea.hbm %s1036_s3, 2048 }
  0x18   :  { %p682_p8 = scmp.ne.s32.totalorder %s1036_s3, %s681_s21  ;;  %p685_p9 = scmp.lt.u32.totalorder %s681_s21, %s1036_s3 }
  0x1a   :  { %p687_p10 = pnand %p685_p9, %p682_p8 }
  0x1c   :  { %690 = shalt.err (!%p687_p10)
}
  0x1d   :  { %s691_s1 = scalar_lea.vmem %s55_s16, 2048  ;;  %p696_p12 = scmp.lt.s32.totalorder %s55_s16, %s55_s16 }
  0x1e   :  { %p692_p11 = scmp.ne.s32.totalorder %s55_s16, %s691_s1  ;;  %p697_p13 = scmp.lt.s32.totalorder %s691_s1, %s691_s1 }
  0x20   :  { %p698_p0 = por %p697_p13, %p696_p12 }
  0x22   :  { %p699_p1 = pnand %p698_p0, %p692_p11 }
  0x24   :  { %702 = shalt.err (!%p699_p1)
}
  0x25   :  { %60 = dma.hbm_to_vmem [thread:$0]  %s1036_s3, 2048, %s55_s16, [#allocation9], %s846_s11, %s846_s11, %s847_s12  }
  0x26   :  { %s703_s30 = scalar_lea.hbm %s1038_s5, 2048 }
  0x27   :  { %p704_p2 = scmp.ne.s32.totalorder %s1038_s5, %s703_s30  ;;  %p707_p3 = scmp.lt.u32.totalorder %s703_s30, %s1038_s5 }
  0x29   :  { %p709_p4 = pnand %p707_p3, %p704_p2 }
  0x2b   :  { %712 = shalt.err (!%p709_p4)
}
  0x2c   :  { %s713_s14 = scalar_lea.vmem %s77_s18, 2048  ;;  %p718_p6 = scmp.lt.s32.totalorder %s77_s18, %s77_s18 }
  0x2d   :  { %p714_p5 = scmp.ne.s32.totalorder %s77_s18, %s713_s14  ;;  %p719_p7 = scmp.lt.s32.totalorder %s713_s14, %s713_s14 }
  0x2f   :  { %p720_p8 = por %p719_p7, %p718_p6 }
  0x31   :  { %p721_p9 = pnand %p720_p8, %p714_p5 }
  0x33   :  { %724 = shalt.err (!%p721_p9)
}
  0x34   :  { %82 = dma.hbm_to_vmem [thread:$0]  %s1038_s5, 2048, %s77_s18, [#allocation12], %s846_s11, %s846_s11, %s847_s12  }
  0x35   :  { %s850_s16 = smov [#allocation2]   ;;  %s851_s19 = smov [#allocation7]  }
  0x36   :  { %s23_s17 = sshll.u32 %s850_s16, 4  ;;  %s45_s20 = sshll.u32 %s851_s19, 4  ;;  %s24_s17 = int_to_ptr.vmem [resolvable:$true] %s23_s17  ;;  %s46_s20 = int_to_ptr.vmem [resolvable:$true] %s45_s20 }
  0x37   :  { %s725_s23 = scalar_lea.hbm %s1033_s0, 128 }
  0x38   :  { %p726_p10 = scmp.ne.s32.totalorder %s1033_s0, %s725_s23  ;;  %p729_p11 = scmp.lt.u32.totalorder %s725_s23, %s1033_s0 }
  0x3a   :  { %p731_p12 = pnand %p729_p11, %p726_p10 }
  0x3c   :  { %734 = shalt.err (!%p731_p12)
}
  0x3d   :  { %s735_s5 = scalar_lea.vmem %s24_s17, 128  ;;  %p740_p0 = scmp.lt.s32.totalorder %s24_s17, %s24_s17 }
  0x3e   :  { %p736_p13 = scmp.ne.s32.totalorder %s24_s17, %s735_s5  ;;  %p741_p1 = scmp.lt.s32.totalorder %s735_s5, %s735_s5 }
  0x40   :  { %p742_p2 = por %p741_p1, %p740_p0 }
  0x42   :  { %p743_p3 = pnand %p742_p2, %p736_p13 }
  0x44   :  { %746 = shalt.err (!%p743_p3)
}
  0x45   :  { %26 = dma.hbm_to_vmem [thread:$0]  %s1033_s0, 128, %s24_s17, [#allocation3]  }
  0x46   :  { %s747_s28 = scalar_lea.hbm %s1035_s2, 16 }
  0x47   :  { %p748_p4 = scmp.ne.s32.totalorder %s1035_s2, %s747_s28  ;;  %p751_p5 = scmp.lt.u32.totalorder %s747_s28, %s1035_s2 }
  0x49   :  { %p753_p6 = pnand %p751_p5, %p748_p4 }
  0x4b   :  { %756 = shalt.err (!%p753_p6)
}
  0x4c   :  { %s757_s10 = scalar_lea.vmem %s46_s20, 16  ;;  %s761_s13 = scalar_lea.vmem %s46_s20, 32 }
  0x4d   :  { %p758_p7 = scmp.ne.s32.totalorder %s46_s20, %s757_s10  ;;  %p762_p8 = scmp.lt.s32.totalorder %s46_s20, %s46_s20 }
  0x4e   :  { %p763_p9 = scmp.lt.s32.totalorder %s761_s13, %s757_s10 }
  0x50   :  { %p764_p10 = por %p763_p9, %p762_p8 }
  0x52   :  { %p765_p11 = pnand %p764_p10, %p758_p7 }
  0x54   :  { %768 = shalt.err (!%p765_p11)
}
  0x55   :  { %48 = dma.hbm_to_vmem [thread:$0]  %s1035_s2, 16, %s46_s20, [#allocation6]  }
  0x56   :  { %s852_s3 = smov [#allocation10]   ;;  %s853_s16 = smov [#allocation13]  }
  0x57   :  { %s67_s15 = sshll.u32 %s852_s3, 4  ;;  %s89_s17 = sshll.u32 %s853_s16, 4  ;;  %s68_s15 = int_to_ptr.vmem [resolvable:$true] %s67_s15  ;;  %s90_s17 = int_to_ptr.vmem [resolvable:$true] %s89_s17 }
  0x58   :  { %s769_s22 = scalar_lea.hbm %s1037_s4, 16 }
  0x59   :  { %p770_p12 = scmp.ne.s32.totalorder %s1037_s4, %s769_s22  ;;  %p773_p13 = scmp.lt.u32.totalorder %s769_s22, %s1037_s4 }
  0x5b   :  { %p775_p0 = pnand %p773_p13, %p770_p12 }
  0x5d   :  { %778 = shalt.err (!%p775_p0)
}
  0x5e   :  { %s779_s2 = scalar_lea.vmem %s68_s15, 16  ;;  %s783_s20 = scalar_lea.vmem %s68_s15, 32 }
  0x5f   :  { %p780_p1 = scmp.ne.s32.totalorder %s68_s15, %s779_s2  ;;  %p784_p2 = scmp.lt.s32.totalorder %s68_s15, %s68_s15 }
  0x60   :  { %p785_p3 = scmp.lt.s32.totalorder %s783_s20, %s779_s2 }
  0x62   :  { %p786_p4 = por %p785_p3, %p784_p2 }
  0x64   :  { %p787_p5 = pnand %p786_p4, %p780_p1 }
  0x66   :  { %790 = shalt.err (!%p787_p5)
}
  0x67   :  { %70 = dma.hbm_to_vmem [thread:$0]  %s1037_s4, 16, %s68_s15, [#allocation9]  }
  0x68   :  { %s791_s18 = scalar_lea.hbm %s1039_s6, 16 }
  0x69   :  { %p792_p6 = scmp.ne.s32.totalorder %s1039_s6, %s791_s18  ;;  %p795_p7 = scmp.lt.u32.totalorder %s791_s18, %s1039_s6 }
  0x6b   :  { %p797_p8 = pnand %p795_p7, %p792_p6 }
  0x6d   :  { %800 = shalt.err (!%p797_p8)
}
  0x6e   :  { %s801_s8 = scalar_lea.vmem %s90_s17, 16  ;;  %s805_s9 = scalar_lea.vmem %s90_s17, 32 }
  0x6f   :  { %p802_p9 = scmp.ne.s32.totalorder %s90_s17, %s801_s8  ;;  %p806_p10 = scmp.lt.s32.totalorder %s90_s17, %s90_s17 }
  0x70   :  { %p807_p11 = scmp.lt.s32.totalorder %s805_s9, %s801_s8 }
  0x72   :  { %p808_p12 = por %p807_p11, %p806_p10 }
  0x74   :  { %p809_p13 = pnand %p808_p12, %p802_p9 }
  0x76   :  { %812 = shalt.err (!%p809_p13)
}
  0x77   :  { %92 = dma.hbm_to_vmem [thread:$0]  %s1039_s6, 16, %s90_s17, [#allocation12]  }
  0x78   :  { %835 = dma.done.wait [#allocation3], 128  }
  0x79   :  { %836 = vsyncadd [#allocation3], 4294967168 }
  0x7a   :  { %837 = dma.done.wait [#allocation6], 2064  }
  0x7b   :  { %838 = vsyncadd [#allocation6], 4294965232 }
  0x7c   :  { %839 = dma.done.wait [#allocation9], 2064  }
  0x7d   :  { %840 = vsyncadd [#allocation9], 4294965232 }
  0x7e   :  { %841 = dma.done.wait [#allocation12], 2064  }
  0x7f   :  { %842 = vsyncadd [#allocation12], 4294965232  ;;  %v854_v0 = vmov 0.0|0.0   ;;  %vm855_vm0 = vmmov 0   ;;  %v856_v1 = vmov 0.0   ;;  %v115_v2 = vld [vmem:[#allocation5] sm:$0xff] }
  0x80   :  { %574 = vmatprep.subr.bf16.mxu0 %v854_v0  ;;  %501 = vmatprep.mubr.msk.f32.mxu0 %vm855_vm0, %v856_v1  ;;  %v116_v3 = vld [vmem:[#allocation5 + $0x8] sm:$0xff]  ;;  %v117_v4 = vld [vmem:[#allocation5 + $0x10] sm:$0xff]  ;;  %v118_v6 = vld [vmem:[#allocation5 + $0x18] sm:$0xff]  ;;  %s857_s6 = smov [#allocation14]  }
  0x81   :  { %598 = vmatprep.subr.bf16.mxu1 %v854_v0  ;;  %536 = vmatprep.mubr.msk.f32.mxu1 %vm855_vm0, %v856_v1  ;;  %v575_v5 = vpack.c.bf16 %v116_v3, %v115_v2  ;;  %v578_v7 = vpack.c.bf16 %v118_v6, %v117_v4  ;;  %v119_v8 = vld [vmem:[#allocation5 + $0x20] sm:$0xff]  ;;  %v120_v9 = vld [vmem:[#allocation5 + $0x28] sm:$0xff]  ;;  %v211_v12 = vld [vmem:[#allocation8 + $0x10] sm:$0xff]  ;;  %s403_s13 = sshll.u32 %s857_s6, 4  ;;  %s404_s13 = int_to_ptr.vmem [resolvable:$true] %s403_s13 }
  0x82   :  { %v209_v10 = vld [vmem:[#allocation8] sm:$0xff]  ;;  %v210_v11 = vld [vmem:[#allocation8 + $0x8] sm:$0xff]  ;;  %v212_v13 = vld [vmem:[#allocation8 + $0x18] sm:$0xff]  ;;  %v581_v14 = vpack.c.bf16 %v120_v9, %v119_v8  ;;  %s813_s0 = scalar_lea.vmem %s404_s13, 128  ;;  %p818_p1 = scmp.lt.s32.totalorder %s404_s13, %s404_s13 }
  0x83   :  { %576 = vmatpush3.bf16.msra.mxu0 %v575_v5  ;;  %v599_v15 = vpack.c.bf16 %v210_v11, %v209_v10  ;;  %v121_v16 = vld [vmem:[#allocation5 + $0x30] sm:$0xff]  ;;  %v122_v17 = vld [vmem:[#allocation5 + $0x38] sm:$0xff]  ;;  %v602_v18 = vpack.c.bf16 %v212_v13, %v211_v12  ;;  %v213_v19 = vld [vmem:[#allocation8 + $0x20] sm:$0xff]  ;;  %p814_p0 = scmp.ne.s32.totalorder %s404_s13, %s813_s0  ;;  %p819_p2 = scmp.lt.s32.totalorder %s813_s0, %s813_s0 }
  0x84   :  { %577 = vmatprep.subr.bf16.mxu0 %v854_v0  ;;  %v214_v20 = vld [vmem:[#allocation8 + $0x28] sm:$0xff]  ;;  %v584_v21 = vpack.c.bf16 %v122_v17, %v121_v16  ;;  %v123_v22 = vld [vmem:[#allocation5 + $0x40] sm:$0xff]  ;;  %v215_v25 = vld [vmem:[#allocation8 + $0x30] sm:$0xff] }
  0x85   :  { %600 = vmatpush3.bf16.msra.mxu1 %v599_v15  ;;  %v124_v23 = vld [vmem:[#allocation5 + $0x48] sm:$0xff]  ;;  %v605_v24 = vpack.c.bf16 %v214_v20, %v213_v19  ;;  %v216_v26 = vld [vmem:[#allocation8 + $0x38] sm:$0xff]  ;;  %v125_v28 = vld [vmem:[#allocation5 + $0x50] sm:$0xff]  ;;  %p820_p3 = por %p819_p2, %p818_p1 }
  0x86   :  { %601 = vmatprep.subr.bf16.mxu1 %v854_v0  ;;  %v587_v27 = vpack.c.bf16 %v124_v23, %v123_v22  ;;  %v126_v29 = vld [vmem:[#allocation5 + $0x58] sm:$0xff]  ;;  %v608_v30 = vpack.c.bf16 %v216_v26, %v215_v25  ;;  %v217_v31 = vld [vmem:[#allocation8 + $0x40] sm:$0xff]  ;;  %v218_v32 = vld [vmem:[#allocation8 + $0x48] sm:$0xff] }
  0x87   :  { %579 = vmatpush3.bf16.msra.mxu0 %v578_v7  ;;  %v590_v33 = vpack.c.bf16 %v126_v29, %v125_v28  ;;  %v127_v34 = vld [vmem:[#allocation5 + $0x60] sm:$0xff]  ;;  %v128_v35 = vld [vmem:[#allocation5 + $0x68] sm:$0xff]  ;;  %v611_v36 = vpack.c.bf16 %v218_v32, %v217_v31  ;;  %v219_v37 = vld [vmem:[#allocation8 + $0x50] sm:$0xff]  ;;  %p821_p4 = pnand %p820_p3, %p814_p0 }
  0x88   :  { %580 = vmatprep.subr.bf16.mxu0 %v854_v0  ;;  %v220_v38 = vld [vmem:[#allocation8 + $0x58] sm:$0xff]  ;;  %v593_v39 = vpack.c.bf16 %v128_v35, %v127_v34  ;;  %v129_v40 = vld [vmem:[#allocation5 + $0x70] sm:$0xff]  ;;  %v221_v43 = vld [vmem:[#allocation8 + $0x60] sm:$0xff] }
  0x89   :  { %603 = vmatpush3.bf16.msra.mxu1 %v602_v18  ;;  %v130_v41 = vld [vmem:[#allocation5 + $0x78] sm:$0xff]  ;;  %v614_v42 = vpack.c.bf16 %v220_v38, %v219_v37  ;;  %v222_v44 = vld [vmem:[#allocation8 + $0x68] sm:$0xff]  ;;  %v415_v9 = vld [vmem:[#allocation7] ss:$0 sm:$0xff] }
  0x8a   :  { %604 = vmatprep.subr.bf16.mxu1 %v854_v0  ;;  %v596_v45 = vpack.c.bf16 %v130_v41, %v129_v40  ;;  %v617_v46 = vpack.c.bf16 %v222_v44, %v221_v43  ;;  %v114_v47 = vld [vmem:[#allocation2] sm:$0xff]  ;;  %v303_v51 = vld [vmem:[#allocation11] sm:$0xff]  ;;  %v304_v52 = vld [vmem:[#allocation11 + $0x8] sm:$0xff] }
  0x8b   :  { %582 = vmatpush3.bf16.msra.mxu0 %v581_v14  ;;  %v223_v48 = vld [vmem:[#allocation8 + $0x70] sm:$0xff]  ;;  %v224_v49 = vld [vmem:[#allocation8 + $0x78] sm:$0xff]  ;;  %v623_v54 = vpack.c.bf16 %v304_v52, %v303_v51  ;;  %v307_v57 = vld [vmem:[#allocation11 + $0x20] sm:$0xff] }
  0x8c   :  { %583 = vmatprep.subr.bf16.mxu0 %v854_v0  ;;  %v620_v50 = vpack.c.bf16 %v224_v49, %v223_v48  ;;  %v305_v53 = vld [vmem:[#allocation11 + $0x10] sm:$0xff]  ;;  %v306_v55 = vld [vmem:[#allocation11 + $0x18] sm:$0xff]  ;;  %v308_v58 = vld [vmem:[#allocation11 + $0x28] sm:$0xff] }
  0x8d   :  { %606 = vmatpush3.bf16.msra.mxu1 %v605_v24  ;;  %v626_v56 = vpack.c.bf16 %v306_v55, %v305_v53  ;;  %v629_v59 = vpack.c.bf16 %v308_v58, %v307_v57  ;;  %v309_v60 = vld [vmem:[#allocation11 + $0x30] sm:$0xff]  ;;  %v310_v61 = vld [vmem:[#allocation11 + $0x38] sm:$0xff]  ;;  %v311_v63 = vld [vmem:[#allocation11 + $0x40] sm:$0xff] }
  0x8e   :  { %607 = vmatprep.subr.bf16.mxu1 %v854_v0  ;;  %v632_v62 = vpack.c.bf16 %v310_v61, %v309_v60  ;;  %v313_v3 = vld [vmem:[#allocation11 + $0x50] sm:$0xff]  ;;  %v314_v4 = vld [vmem:[#allocation11 + $0x58] sm:$0xff]  ;;  %v315_v6 = vld [vmem:[#allocation11 + $0x60] sm:$0xff] }
  0x8f   :  { %585 = vmatpush3.bf16.msra.mxu0 %v584_v21  ;;  %v638_v5 = vpack.c.bf16 %v314_v4, %v313_v3  ;;  %v316_v7 = vld [vmem:[#allocation11 + $0x68] sm:$0xff]  ;;  %v317_v14 = vld [vmem:[#allocation11 + $0x70] sm:$0xff]  ;;  %v318_v15 = vld [vmem:[#allocation11 + $0x78] sm:$0xff] }
  0x90   :  { %586 = vmatprep.subr.bf16.mxu0 %v854_v0  ;;  %v641_v8 = vpack.c.bf16 %v316_v7, %v315_v6  ;;  %v644_v16 = vpack.c.bf16 %v318_v15, %v317_v14  ;;  %v416_v17 = vld [vmem:[#allocation10] ss:$0 sm:$0xff]  ;;  %v417_v22 = vld [vmem:[#allocation13] ss:$0 sm:$0xff] }
  0x91   :  { %609 = vmatpush3.bf16.msra.mxu1 %v608_v30 }
  0x92   :  { %610 = vmatprep.subr.bf16.mxu1 %v854_v0 }
  0x93   :  { %588 = vmatpush3.bf16.msra.mxu0 %v587_v27 }
  0x94   :  { %589 = vmatprep.subr.bf16.mxu0 %v854_v0 }
  0x95   :  { %612 = vmatpush3.bf16.msra.mxu1 %v611_v36 }
  0x96   :  { %613 = vmatprep.subr.bf16.mxu1 %v854_v0 }
  0x97   :  { %591 = vmatpush3.bf16.msra.mxu0 %v590_v33 }
  0x98   :  { %592 = vmatprep.subr.bf16.mxu0 %v854_v0 }
  0x99   :  { %615 = vmatpush3.bf16.msra.mxu1 %v614_v42 }
  0x9a   :  { %616 = vmatprep.subr.bf16.mxu1 %v854_v0 }
  0x9b   :  { %594 = vmatpush3.bf16.msra.mxu0 %v593_v39 }
  0x9c   :  { %595 = vmatprep.subr.bf16.mxu0 %v854_v0 }
  0x9d   :  { %618 = vmatpush3.bf16.msra.mxu1 %v617_v46 }
  0x9e   :  { %619 = vmatprep.subr.bf16.mxu1 %v854_v0 }
  0x9f   :  { %597 = vmatpush3.bf16.msra.mxu0 %v596_v45 }
  0xa0   :  { %622 = vmatprep.subr.bf16.mxu0 %v854_v0 }
  0xa1   :  { %621 = vmatpush3.bf16.msra.mxu1 %v620_v50 }
  0xa2   :  { %502 = vmatmul.mubr.f32.vlgmr.msra.gmra.mrb[0].mxu0 %v114_v47 }
  0xa3   :  { %571 = vmatprep.mubr.msk.f32.mxu0 %vm855_vm0, %v856_v1  ;;  %624 = vmatpush3.bf16.msra.mxu0 %v623_v54  ;;  %v312_v1 = vld [vmem:[#allocation11 + $0x48] sm:$0xff] }
  0xa4   :  { %625 = vmatprep.subr.bf16.mxu0 %v854_v0  ;;  %v635_v2 = vpack.c.bf16 %v312_v1, %v311_v63 }
  0xa7   :  { %627 = vmatpush3.bf16.msra.mxu0 %v626_v56 }
  0xa8   :  { %628 = vmatprep.subr.bf16.mxu0 %v854_v0 }
  0xab   :  { %630 = vmatpush3.bf16.msra.mxu0 %v629_v59 }
  0xac   :  { %631 = vmatprep.subr.bf16.mxu0 %v854_v0 }
  0xaf   :  { %633 = vmatpush3.bf16.msra.mxu0 %v632_v62 }
  0xb0   :  { %634 = vmatprep.subr.bf16.mxu0 %v854_v0 }
  0xb3   :  { %636 = vmatpush3.bf16.msra.mxu0 %v635_v2 }
  0xb4   :  { %637 = vmatprep.subr.bf16.mxu0 %v854_v0 }
  0xb7   :  { %639 = vmatpush3.bf16.msra.mxu0 %v638_v5 }
  0xb8   :  { %640 = vmatprep.subr.bf16.mxu0 %v854_v0 }
  0xbb   :  { %642 = vmatpush3.bf16.msra.mxu0 %v641_v8 }
  0xbc   :  { %643 = vmatprep.subr.bf16.mxu0 %v854_v0 }
  0xbf   :  { %645 = vmatpush3.bf16.msra.mxu0 %v644_v16 }
 0x175   :  { %v204_v10 = vpop.f32.mrb[0].mxu0 }
 0x176   :  { %v205_v11 = vadd.f32 %v415_v9, %v204_v10  ;;  %v503_v12 = vpop.f32.mrb[1].mxu0 }
 0x178   :  { %v208_v13 = vmax.f32 %v205_v11, 0.0 }
 0x17a   :  { %537 = vmatmul.mubr.f32.vlgmr.msra.gmra.mrb[0].mxu1 %v208_v13 }
 0x24d   :  { %v298_v18 = vpop.f32.mrb[0].mxu1 }
 0x24e   :  { %v299_v19 = vadd.f32 %v416_v17, %v298_v18  ;;  %v538_v20 = vpop.f32.mrb[1].mxu1 }
 0x250   :  { %v302_v21 = vmax.f32 %v299_v19, 0.0 }
 0x252   :  { %572 = vmatmul.mubr.f32.vlgmr.msra.gmra.mrb[2].mxu0 %v302_v21 }
 0x325   :  { %v392_v0 = vpop.f32.mrb[2].mxu0 }
 0x326   :  { %v393_v23 = vadd.f32 %v417_v22, %v392_v0  ;;  %v573_v24 = vpop.f32.mrb[3].mxu0 }
 0x328   :  { %396 = vst [vmem:[#allocation14] sm:$0xff] %v393_v23 }
 0x329   :  { %824 = shalt.err (!%p821_p4)
}
 0x32a   :  { %s825_s15 = scalar_lea.hbm %s1040_s7, 128 }
 0x32b   :  { %p826_p5 = scmp.ne.s32.totalorder %s1040_s7, %s825_s15  ;;  %p829_p6 = scmp.lt.u32.totalorder %s825_s15, %s1040_s7 }
 0x32d   :  { %p831_p7 = pnand %p829_p6, %p826_p5 }
 0x32f   :  { %834 = shalt.err (!%p831_p7)
}
 0x330   :  { %406 = dma.vmem_to_hbm [thread:$0]  %s404_s13, 128, %s1040_s7, [#allocation4]  }
 0x331   :  { %843 = dma.done.wait [#allocation4], 128  }
 0x332   :  { %844 = vsyncadd [#allocation4], 4294967168 }
 0x333   :  { %410 = vsyncpa [#allocation3], 1 }
 0x334   :  { %411 = vsyncpa [#allocation6], 1 }
 0x335   :  { %412 = vsyncpa [#allocation9], 1 }
 0x336   :  { %413 = vsyncpa [#allocation12], 1 }
 0x337   :  { %414 = vsyncpa [#allocation4], 1 }

</bundles_post_ra>
